<compile_context>
chip_gen: v5e
topology: v5e:2x2
jax: 0.10.0
libtpu: 0.0.40
codegen_flags: <defaults>
</compile_context>

<pallas_src>
import functools

import jax
import jax.numpy as jnp
from jax.experimental import pallas as pl
from jax.experimental.pallas import tpu as pltpu


def _dice_kernel(logits_ref, labels_ref, out_ref, inter_ref, union_ref,
                 *, s_valid, ts):
    """Grid = (B, n_s). logits_ref: (1, C, TS) bf16; labels_ref: (1, 1, TS) int8.

    inter_ref / union_ref: (C, 1) f32 scratch accumulated over the S tiles of
    the current batch element. out_ref: (1, C, 1) per-batch dice, written only
    on the last S tile.
    """
    si = pl.program_id(1)
    n_s = pl.num_programs(1)

    @pl.when(si == 0)
    def _():
        inter_ref[...] = jnp.zeros_like(inter_ref)
        union_ref[...] = jnp.zeros_like(union_ref)

    logits = logits_ref[0].astype(jnp.float32)      # (C, TS) — f32 math (v5e safe)
    labels = labels_ref[0].astype(jnp.int32)        # (1, TS)
    C = logits.shape[0]

    # Cheap (C, 1) class-index column; broadcasts in the compares below.
    class_col = jax.lax.broadcasted_iota(jnp.int32, (C, 1), 0)

    # argmax over the class (sublane) axis, first-occurrence tie-break
    # (min index among the maxima), matching torch.argmax.
    maxval = jnp.max(logits, axis=0, keepdims=True)              # (1, TS)
    cand = jnp.where(logits == maxval, class_col, C)             # (C, TS)
    pred = jnp.min(cand, axis=0, keepdims=True)                  # (1, TS)

    pred_oh = class_col == pred                                  # (C, TS) bool
    tgt_oh = class_col == labels                                 # (C, TS) bool

    if s_valid is not None:
        # S was padded to a multiple of TS: mask out padded voxels for the
        # prediction (labels were padded with -1 so tgt_oh is already False).
        pos = si * ts + jax.lax.broadcasted_iota(jnp.int32, (1, ts), 1)
        pred_oh = jnp.logical_and(pred_oh, pos < s_valid)

    pred_f = pred_oh.astype(jnp.float32)
    tgt_f = tgt_oh.astype(jnp.float32)

    # Two cross-lane reductions per tile (single combined sum for the union).
    inter_ref[...] += jnp.sum(pred_f * tgt_f, axis=1, keepdims=True)   # (C, 1)
    union_ref[...] += jnp.sum(pred_f + tgt_f, axis=1, keepdims=True)   # (C, 1)

    @pl.when(si == n_s - 1)
    def _():
        out_ref[0] = 2.0 * inter_ref[...] / (union_ref[...] + 1e-5)


def _vmem_capacity_bytes(default=64 << 20):
    try:
        return int(pltpu.get_tpu_info().vmem_capacity_bytes)
    except Exception:
        return default


def dice_score(output, target, *, compute_dtype=jnp.bfloat16):
    """output: (B, C, D, H, W) float logits; target: (B, 1, D, H, W) int labels.

    Returns (C,) float32 Dice score averaged over batch. Logits are streamed
    as `compute_dtype` (bf16 by default) to halve HBM traffic; argmax on
    near-equal logits can therefore differ from a pure-f32 computation.
    """
    B, C, D, H, W = output.shape
    S = D * H * W

    logits = output.reshape(B, C, S).astype(compute_dtype)
    label_dtype = jnp.int8 if C <= 127 else jnp.int32
    labels = target.reshape(B, 1, S).astype(label_dtype)

    # ---- generation-aware tile sizing ------------------------------------
    vmem_phys = _vmem_capacity_bytes()                  # 128 MiB v5e/v6e, 64 MiB v7x
    vmem_limit = int(min(vmem_phys // 2, 64 << 20))     # scoped limit we request
    tile_budget = vmem_limit // 2                       # leave headroom

    logit_bytes = jnp.dtype(compute_dtype).itemsize
    label_bytes = jnp.dtype(label_dtype).itemsize
    # Per-voxel footprint: double-buffered input tiles + a conservative bound
    # on f32 intermediates materialized by the compute body.
    per_voxel = 2 * (C * logit_bytes + label_bytes) + 4 * (9 * C + 6)
    ts = max(128, (tile_budget // per_voxel) // 128 * 128)

    if S <= ts:
        ts = S                      # single full-dim tile (no 128 alignment needed)
        s_pad = S
    else:
        s_pad = ((S + ts - 1) // ts) * ts

    if s_pad != S:
        pad = s_pad - S
        logits = jnp.pad(logits, ((0, 0), (0, 0), (0, pad)))
        labels = jnp.pad(labels, ((0, 0), (0, 0), (0, pad)), constant_values=-1)
        s_valid = S
    else:
        s_valid = None
    n_s = s_pad // ts

    kernel = functools.partial(_dice_kernel, s_valid=s_valid, ts=ts)

    per_batch = pl.pallas_call(
        kernel,
        out_shape=jax.ShapeDtypeStruct((B, C, 1), jnp.float32),
        grid_spec=pltpu.PrefetchScalarGridSpec(
            num_scalar_prefetch=0,
            grid=(B, n_s),
            in_specs=[
                pl.BlockSpec((1, C, ts), lambda b, s: (b, 0, s)),
                pl.BlockSpec((1, 1, ts), lambda b, s: (b, 0, s)),
            ],
            out_specs=pl.BlockSpec((1, C, 1), lambda b, s: (b, 0, 0)),
            scratch_shapes=[
                pltpu.VMEM((C, 1), jnp.float32),   # intersection accumulator
                pltpu.VMEM((C, 1), jnp.float32),   # union accumulator
            ],
        ),
        compiler_params=pltpu.CompilerParams(
            dimension_semantics=("parallel", "arbitrary"),
            vmem_limit_bytes=vmem_limit),
    )(logits, labels)

    return jnp.mean(per_batch[:, :, 0], axis=0)


def _reference_dice(output, target):
    C = output.shape[1]
    pred = jnp.argmax(output, axis=1)                 # (B, D, H, W)
    tgt = target[:, 0].astype(jnp.int32)              # (B, D, H, W)
    pred_oh = jax.nn.one_hot(pred, C, axis=1, dtype=jnp.float32)
    tgt_oh = jax.nn.one_hot(tgt, C, axis=1, dtype=jnp.float32)
    reduce_axes = (2, 3, 4)
    inter = 2.0 * (pred_oh * tgt_oh).sum(axis=reduce_axes)
    union = pred_oh.sum(axis=reduce_axes) + tgt_oh.sum(axis=reduce_axes)
    return (inter / (union + 1e-5)).mean(axis=0)


if __name__ == "__main__":
    B, C, D, H, W = 2, 4, 4, 8, 8
    key = jax.random.PRNGKey(0)
    k_logits, k_labels = jax.random.split(key)

    output = jax.random.normal(k_logits, (B, C, D, H, W), dtype=jnp.float32)
    target = jax.random.randint(k_labels, (B, 1, D, H, W), 0, C, dtype=jnp.int32)

    result = dice_score(output, target)
    jax.block_until_ready(result)

    # The kernel streams logits as bf16 (bandwidth optimization); evaluate the
    # reference on identically-rounded logits so argmax decisions match exactly.
    ref = _reference_dice(output.astype(jnp.bfloat16).astype(jnp.float32), target)
    assert result.shape == (C,)
    assert jnp.allclose(result, ref, atol=1e-5, rtol=1e-5), (result, ref)

    print("KERNEL_OK")
</pallas_src>

<mosaic_0001>
module attributes {stable_mosaic.version = 11 : i64} {
  func.func @_dice_kernel(%arg0: i32, %arg1: i32, %arg2: memref<1x4x256xbf16, #tpu.memory_space<vmem>>, %arg3: memref<1x1x256xi8, #tpu.memory_space<vmem>>, %arg4: memref<1x4x1xf32, #tpu.memory_space<vmem>>, %arg5: memref<4x1xf32, #tpu.memory_space<vmem>>, %arg6: memref<4x1xf32, #tpu.memory_space<vmem>>) attributes {dimension_semantics = [#tpu.dimension_semantics<parallel>, #tpu.dimension_semantics<arbitrary>], iteration_bounds = array<i64: 2, 1>, scalar_prefetch = 0 : i64, scratch_operands = 2 : i64, tpu.core_type = #tpu.core_type<tc>, window_params = [{transform_indices = @transform_0, window_bounds = array<i64: 1, 4, 256>}, {transform_indices = @transform_1, window_bounds = array<i64: 1, 1, 256>}, {transform_indices = @transform_2, window_bounds = array<i64: 1, 4, 1>}]} {
    %c0_i32 = arith.constant 0 : i32
    %0 = arith.cmpi eq, %arg1, %c0_i32 : i32
    %1 = arith.extui %0 : i1 to i32
    %c0_i32_0 = arith.constant 0 : i32
    %2 = arith.cmpi ne, %1, %c0_i32_0 : i32
    scf.if %2 {
      %cst_19 = arith.constant 0.000000e+00 : f32
      %45 = vector.broadcast %cst_19 : f32 to vector<4x1xf32>
      %c0_20 = arith.constant 0 : index
      %c0_21 = arith.constant 0 : index
      %46 = vector.load %arg5[%c0_20, %c0_21] : memref<4x1xf32, #tpu.memory_space<vmem>>, vector<4x1xf32>
      tpu.vector_store %arg5[%c0_20, %c0_21], %45 {strides = array<i32>} : memref<4x1xf32, #tpu.memory_space<vmem>>, vector<4x1xf32>,
      %cst_22 = arith.constant 0.000000e+00 : f32
      %47 = vector.broadcast %cst_22 : f32 to vector<4x1xf32>
      %c0_23 = arith.constant 0 : index
      %c0_24 = arith.constant 0 : index
      %48 = vector.load %arg6[%c0_23, %c0_24] : memref<4x1xf32, #tpu.memory_space<vmem>>, vector<4x1xf32>
      tpu.vector_store %arg6[%c0_23, %c0_24], %47 {strides = array<i32>} : memref<4x1xf32, #tpu.memory_space<vmem>>, vector<4x1xf32>,
    } else {
    }
    %c0 = arith.constant 0 : index
    %c0_1 = arith.constant 0 : index
    %c0_2 = arith.constant 0 : index
    %3 = vector.load %arg2[%c0, %c0_1, %c0_2] : memref<1x4x256xbf16, #tpu.memory_space<vmem>>, vector<1x4x256xbf16>
    %4 = vector.shape_cast %3 : vector<1x4x256xbf16> to vector<4x256xbf16>
    %5 = arith.extf %4 : vector<4x256xbf16> to vector<4x256xf32>
    %c0_3 = arith.constant 0 : index
    %c0_4 = arith.constant 0 : index
    %c0_5 = arith.constant 0 : index
    %6 = vector.load %arg3[%c0_3, %c0_4, %c0_5] : memref<1x1x256xi8, #tpu.memory_space<vmem>>, vector<1x1x256xi8>
    %7 = vector.shape_cast %6 : vector<1x1x256xi8> to vector<1x256xi8>
    %8 = arith.extsi %7 : vector<1x256xi8> to vector<1x256xi32>
    %9 = tpu.iota {dimensions = array<i32: 0>} : vector<4x1xi32>
    %cst = arith.constant dense<0xFF800000> : vector<256xf32>
    %10 = vector.multi_reduction <maximumf>, %5, %cst [0] : vector<4x256xf32> to vector<256xf32>
    %11 = vector.shape_cast %10 : vector<256xf32> to vector<1x256xf32>
    %12 = vector.broadcast %11 : vector<1x256xf32> to vector<4x256xf32>
    %13 = arith.cmpf oeq, %5, %12 : vector<4x256xf32>
    %c4_i32 = arith.constant 4 : i32
    %14 = vector.shape_cast %9 : vector<4x1xi32> to vector<4x1xi32>
    %15 = vector.broadcast %14 : vector<4x1xi32> to vector<4x256xi32>
    %16 = vector.broadcast %c4_i32 : i32 to vector<4x256xi32>
    %17 = arith.select %13, %15, %16 : vector<4x256xi1>, vector<4x256xi32>
    %cst_6 = arith.constant dense<2147483647> : vector<256xi32>
    %18 = vector.multi_reduction <minsi>, %17, %cst_6 [0] : vector<4x256xi32> to vector<256xi32>
    %19 = vector.shape_cast %18 : vector<256xi32> to vector<1x256xi32>
    %20 = vector.broadcast %9 : vector<4x1xi32> to vector<4x256xi32>
    %21 = vector.broadcast %19 : vector<1x256xi32> to vector<4x256xi32>
    %22 = arith.cmpi eq, %20, %21 : vector<4x256xi32>
    %23 = vector.broadcast %9 : vector<4x1xi32> to vector<4x256xi32>
    %24 = vector.broadcast %8 : vector<1x256xi32> to vector<4x256xi32>
    %25 = arith.cmpi eq, %23, %24 : vector<4x256xi32>
    %26 = arith.extui %22 : vector<4x256xi1> to vector<4x256xi32>
    %27 = arith.sitofp %26 : vector<4x256xi32> to vector<4x256xf32>
    %28 = arith.extui %25 : vector<4x256xi1> to vector<4x256xi32>
    %29 = arith.sitofp %28 : vector<4x256xi32> to vector<4x256xf32>
    %c0_7 = arith.constant 0 : index
    %c0_8 = arith.constant 0 : index
    %30 = vector.load %arg5[%c0_7, %c0_8] : memref<4x1xf32, #tpu.memory_space<vmem>>, vector<4x1xf32>
    %31 = arith.mulf %27, %29 : vector<4x256xf32>
    %cst_9 = arith.constant dense<0.000000e+00> : vector<4xf32>
    %32 = vector.multi_reduction <add>, %31, %cst_9 [1] : vector<4x256xf32> to vector<4xf32>
    %33 = vector.shape_cast %32 : vector<4xf32> to vector<4x1xf32>
    %34 = arith.addf %30, %33 : vector<4x1xf32>
    %c0_10 = arith.constant 0 : index
    %c0_11 = arith.constant 0 : index
    %35 = vector.load %arg5[%c0_10, %c0_11] : memref<4x1xf32, #tpu.memory_space<vmem>>, vector<4x1xf32>
    tpu.vector_store %arg5[%c0_10, %c0_11], %34 {strides = array<i32>} : memref<4x1xf32, #tpu.memory_space<vmem>>, vector<4x1xf32>,
    %c0_12 = arith.constant 0 : index
    %c0_13 = arith.constant 0 : index
    %36 = vector.load %arg6[%c0_12, %c0_13] : memref<4x1xf32, #tpu.memory_space<vmem>>, vector<4x1xf32>
    %37 = arith.addf %27, %29 : vector<4x256xf32>
    %cst_14 = arith.constant dense<0.000000e+00> : vector<4xf32>
    %38 = vector.multi_reduction <add>, %37, %cst_14 [1] : vector<4x256xf32> to vector<4xf32>
    %39 = vector.shape_cast %38 : vector<4xf32> to vector<4x1xf32>
    %40 = arith.addf %36, %39 : vector<4x1xf32>
    %c0_15 = arith.constant 0 : index
    %c0_16 = arith.constant 0 : index
    %41 = vector.load %arg6[%c0_15, %c0_16] : memref<4x1xf32, #tpu.memory_space<vmem>>, vector<4x1xf32>
    tpu.vector_store %arg6[%c0_15, %c0_16], %40 {strides = array<i32>} : memref<4x1xf32, #tpu.memory_space<vmem>>, vector<4x1xf32>,
    %c0_i32_17 = arith.constant 0 : i32
    %42 = arith.cmpi eq, %arg1, %c0_i32_17 : i32
    %43 = arith.extui %42 : i1 to i32
    %c0_i32_18 = arith.constant 0 : i32
    %44 = arith.cmpi ne, %43, %c0_i32_18 : i32
    scf.if %44 {
      %c0_19 = arith.constant 0 : index
      %c0_20 = arith.constant 0 : index
      %45 = vector.load %arg5[%c0_19, %c0_20] : memref<4x1xf32, #tpu.memory_space<vmem>>, vector<4x1xf32>
      %cst_21 = arith.constant 2.000000e+00 : f32
      %46 = vector.broadcast %cst_21 : f32 to vector<4x1xf32>
      %47 = arith.mulf %46, %45 : vector<4x1xf32>
      %c0_22 = arith.constant 0 : index
      %c0_23 = arith.constant 0 : index
      %48 = vector.load %arg6[%c0_22, %c0_23] : memref<4x1xf32, #tpu.memory_space<vmem>>, vector<4x1xf32>
      %cst_24 = arith.constant 9.99999974E-6 : f32
      %49 = vector.broadcast %cst_24 : f32 to vector<4x1xf32>
      %50 = arith.addf %48, %49 : vector<4x1xf32>
      %51 = arith.divf %47, %50 : vector<4x1xf32>
      %c0_25 = arith.constant 0 : index
      %c0_26 = arith.constant 0 : index
      %c0_27 = arith.constant 0 : index
      %52 = vector.load %arg4[%c0_25, %c0_26, %c0_27] : memref<1x4x1xf32, #tpu.memory_space<vmem>>, vector<1x4x1xf32>
      %53 = vector.shape_cast %52 : vector<1x4x1xf32> to vector<4x1xf32>
      %54 = vector.shape_cast %51 : vector<4x1xf32> to vector<1x4x1xf32>
      tpu.vector_store %arg4[%c0_25, %c0_26, %c0_27], %54 {strides = array<i32>} : memref<1x4x1xf32, #tpu.memory_space<vmem>>, vector<1x4x1xf32>,
    } else {
    }
    return
  }
  func.func @transform_0(%arg0: i32, %arg1: i32) -> (i32, i32, i32) {
    %c0_i32 = arith.constant 0 : i32
    %c0_i32_0 = arith.constant 0 : i32
    return %arg0, %c0_i32, %arg1 : i32, i32, i32
  }
  func.func @transform_1(%arg0: i32, %arg1: i32) -> (i32, i32, i32) {
    %c0_i32 = arith.constant 0 : i32
    %c0_i32_0 = arith.constant 0 : i32
    return %arg0, %c0_i32, %arg1 : i32, i32, i32
  }
  func.func @transform_2(%arg0: i32, %arg1: i32) -> (i32, i32, i32) {
    %c0_i32 = arith.constant 0 : i32
    %c0_i32_0 = arith.constant 0 : i32
    %c0_i32_1 = arith.constant 0 : i32
    return %arg0, %c0_i32, %c0_i32_0 : i32, i32, i32
  }
}

</mosaic_0001>

<bundles_post_ra>
// kernel: tpu_custom_call.1
= control target key start
LH: loop header
LB: loop body
LE: loop exit
PB: predicated region body
PF: predicated region fallthrough
CT: control target
= control target key end

     0   :  { %7 = vsyncpa [#allocation5], 0  ;;  %s716_s0 = inlined_call_operand.hbm [shape: bf16[2,4,256], index: 0, kind: input, shape index: {}]   ;;  %s717_s1 = inlined_call_operand.vmem [shape: s8[2,1,256], index: 1, kind: input, shape index: {}]   ;;  %s718_s2 = inlined_call_operand.vmem [shape: f32[2,4,1], index: 2, kind: output, shape index: {}]  }
   0x1   :  { %9 = vsyncpa [#allocation5 + $0x1], 0  ;;  %s607_s9 = smov 0   ;;  %s609_s10 = smov 0  }
   0x2   :  { %s611_s11 = smov 0   ;;  %s613_s12 = smov 0  }
   0x3   :  { %s615_s13 = smov 0   ;;  %s617_s14 = smov 0  }
   0x4 LB: > { %s431_s15 = sadd.s32 4294967295, %s588_s14   ;;  %s27_s16 = sadd.s32 1, %s584_s13  ;;  %s588_s14 = sphi %s617_s14, %s15_s14   ;;  %s584_s13 = sphi %s615_s13, %s725_s13   ;;  %s580_s12 = sphi %s613_s12, %s724_s12   ;;  %s576_s11 = sphi %s611_s11, %s723_s11   ;;  %s572_s10 = sphi %s609_s10, %s722_s10   ;;  %s568_s9 = sphi %s607_s9, %s721_s9  }
   0x5   : > { %p29_p0 = scmp.ge.s32.totalorder %s27_s16, 2  ;;  %s36_s17 = sadd.s32 1, %s576_s11 }
   0x6   : > { %p43_p1 = scmp.ne.s32.totalorder %s576_s11, %s572_s10  ;;  %p44_p2 = scmp.eq.s32.totalorder %s588_s14, 0 }
   0x7   : > { %s727_s16 = smov (%p29_p0, %s27_s16), 0  ;;  %p49_p4 = scmp.ne.s32.totalorder %s572_s10, %s568_s9 }
   0x8   : > { %p643_p3 = por %p44_p2, %p43_p1  ;;  %s31_s19 = ssub.s32 %s584_s13, %s727_s16 }
   0x9   : > { %p50_p5 = scmp.eq.s32.totalorder %s431_s15, 0  ;;  %p34_p6 = scmp.eq.s32.totalorder %s31_s19, 0 }
   0xa   : > { %p455_p8 = scmp.lt.s32.totalorder %s588_s14, 2  ;;  %s127_s22 = sand.u32 1, %s576_s11  }
   0xb   : > { %p650_p7 = por %p50_p5, %p49_p4  ;;  %s448_s23 = sshll.u32 %s584_s13, 2 }
   0xc   : > { %s656_s21 = scalar_select %p34_p6, %s576_s11, %s36_s17  }
   0xd   : > { %s435_s24 = sshll.u32 %s127_s22, 2  ;;  %s138_s27 = scalar_lea.hbm %s716_s0, %s448_s23 }
   0xe   : > { %s140_s28 = sshll.u32 %s138_s27, 4  ;;  %s131_s29 = scalar_lea.vmem [#allocation4], %s435_s24  ;;  %s141_s28 = int_to_ptr.hbm [resolvable:$true] %s140_s28 }
   0xf   : > { %s142_s30 = sshll.u32 %s131_s29, 4  ;;  %p452_p9 = pnand %p455_p8, %p643_p3  ;;  %s143_s30 = int_to_ptr.vmem [resolvable:$true] %s142_s30 }
  0x10   : > { %p438_p10 = scmp.ge.s32.totalorder %s588_s14, 1  ;;  %p159_p11 = scmp.lt.s32.totalorder %s588_s14, 3 }
  0x11   : > { %s128_s3 = scalar_lea.sflag [#allocation5], %s127_s22 }
  0x12   : > { %454 = dma.hbm_to_vmem [thread:$0]  (!%p452_p9), %s141_s28, 64, %s143_s30, %s128_s3  }
  0x13   : > { %p160_p12 = pnand %p438_p10, %p159_p11 }
  0x14   : > { %s165_s4 = sand.u32 (!%p160_p12), 1, %s572_s10  }
  0x15   : > { %163 = sbr.rel (%p160_p12) target bundleno = 232 (0xe8), region = 28  ;;  %s439_s5 = sshll.u32 (!%p160_p12), %s165_s4, 2 }
  0x16   : > { %s166_s6 = scalar_lea.sflag (!%p160_p12), [#allocation5], %s165_s4  ;;  %s169_s7 = scalar_lea.vmem (!%p160_p12), [#allocation4], %s439_s5 }
  0x1a   : > { %563 = dma.done.wait (%p650_p7), %s166_s6, 64  }
  0x1b   : > { %565 = vsyncadd (%p650_p7), %s166_s6, 4294967232  ;;  %v219_v0 = vld [vmem:[%s169_s7] sm:$0xf]  ;;  %vm231_vm0 = vcmask 1043456   ;;  %v223_v10 = vlaneseq  ;;  %v590_v13 = vmov 839922192  }
  0x1c   : > { %v220_v1 = vunpack.c.l.bf16 %v219_v0  ;;  %v253_v14 = vunpack.c.l.s4 %v590_v13  ;;  %p200_p13 = scmp.lt.s32.totalorder %s580_s12, 1  ;;  %vm216_vm2 = vcmask 3072   ;;  %v591_v29 = vmov 0.0  }
  0x1d   : > { %v224_v17 = vshrl.u32 %v223_v10, 7  ;;  %218 = vst.msk [vmem:[#allocation3] sm:$0xf] %vm216_vm2, %v591_v29 }
  0x1e   : > { %226 = vst [vmem:[#allocation1] ss:$2 sm:$0xff] %v220_v1  ;;  %v254_v20 = vunpack.c.0.s8 %v253_v14  ;;  %s729_s12 = smov (!%p200_p13, %s580_s12), 1 }
  0x1f   : > { %s440_s8 = sshll.u32 %s729_s12, 1  ;;  %217 = vst.msk [vmem:[#allocation2] sm:$0xf] %vm216_vm2, %v591_v29  ;;  %s441_s18 = sshll.u32 %s729_s12, 2 }
  0x20   : > { %v255_v24 = vperm.slane %v224_v17, %v254_v20  ;;  %s206_s17 = scalar_lea.vmem %s717_s1, %s440_s8  ;;  %s211_s22 = scalar_lea.vmem %s718_s2, %s441_s18 }
  0x21   : > { %v221_v27 = vld [vmem:[%s206_s17] sm:$0x3] }
  0x22   : > { %v222_v28 = vunpack.c.0.s8 %v221_v27 }
  0x24   : > { %v282_v36 = vperm.slane %v222_v28, 0  ;;  %v283_v37 = vperm.slane %v222_v28, 4  ;;  %v307_v0 = vld [vmem:[#allocation3] sm:$0xf] }
  0x25   : > { %v227_v2 = vld.sshfl [vmem:[#allocation1] sm:$0xff pattern:$0x75316420]  ;;  %v228_v3 = vld.sshfl [vmem:[#allocation1 + $0x8] sm:$0xff pattern:$0x75316420] }
  0x26   : > { %v232_v4 = vsel %vm231_vm0, %v227_v2, -inf  ;;  %v239_v5 = vsel %vm231_vm0, %v228_v3, -inf  ;;  %v284_v42 = vperm.slane %v282_v36, 0  ;;  %v285_v43 = vperm.slane %v283_v37, 0  ;;  %v296_v3 = vld [vmem:[#allocation2] sm:$0xf] }
  0x27   : > { %v233_v6 = vrot.slane %v232_v4, 4  ;;  %v240_v7 = vrot.slane %v239_v5, 4 }
  0x28   : > { %vm286_vm7 = vcmp.eq.s32.totalorder %v224_v17, %v284_v42  ;;  %vm287_vm8 = vcmp.eq.s32.totalorder %v224_v17, %v285_v43 }
  0x29   : > { %v234_v8 = vmax.f32 %v232_v4, %v233_v6  ;;  %v241_v9 = vmax.f32 %v239_v5, %v240_v7  ;;  %v444_v50 = vsel %vm286_vm7, 1.0, %v591_v29  ;;  %v445_v51 = vsel %vm287_vm8, 1.0, %v591_v29 }
  0x2b   : > { %v235_v11 = vrot.slane %v234_v8, 2  ;;  %v242_v12 = vrot.slane %v241_v9, 2 }
  0x2d   : > { %v236_v15 = vmax.f32 %v234_v8, %v235_v11  ;;  %v243_v16 = vmax.f32 %v241_v9, %v242_v12 }
  0x2f   : > { %v237_v18 = vrot.slane %v236_v15, 1  ;;  %v244_v19 = vrot.slane %v243_v16, 1 }
  0x31   : > { %v238_v21 = vmax.f32 %v236_v15, %v237_v18  ;;  %v245_v22 = vmax.f32 %v243_v16, %v244_v19 }
  0x33   : > { %v248_v23 = vrot.slane %v245_v22, 4 }
  0x35   : > { %v249_v25 = vsel %vm231_vm0, %v238_v21, %v248_v23 }
  0x36   : > { %vm251_vm1 = vcmp.eq.f32.partialorder %v220_v1, %v249_v25 }
  0x37   : > { %v256_v26 = vsel %vm251_vm1, %v255_v24, 4 }
  0x38   : > { %257 = vst [vmem:[#allocation1] ss:$2 sm:$0xff] %v256_v26 }
  0x3f   : > { %v258_v30 = vld.sshfl [vmem:[#allocation1] sm:$0xff pattern:$0x75316420]  ;;  %v259_v31 = vld.sshfl [vmem:[#allocation1 + $0x8] sm:$0xff pattern:$0x75316420] }
  0x40   : > { %v260_v32 = vsel %vm231_vm0, %v258_v30, 2147483647  ;;  %v270_v33 = vsel %vm231_vm0, %v259_v31, 2147483647 }
  0x41   : > { %v261_v34 = vrot.slane %v260_v32, 4  ;;  %v271_v35 = vrot.slane %v270_v33, 4 }
  0x43   : > { %vm262_vm3 = vcmp.lt.s32.totalorder %v260_v32, %v261_v34  ;;  %vm272_vm4 = vcmp.lt.s32.totalorder %v270_v33, %v271_v35 }
  0x44   : > { %v263_v38 = vsel %vm262_vm3, %v260_v32, %v261_v34  ;;  %v273_v39 = vsel %vm272_vm4, %v270_v33, %v271_v35 }
  0x45   : > { %v264_v40 = vrot.slane %v263_v38, 2  ;;  %v274_v41 = vrot.slane %v273_v39, 2 }
  0x47   : > { %vm265_vm5 = vcmp.lt.s32.totalorder %v263_v38, %v264_v40  ;;  %vm275_vm6 = vcmp.lt.s32.totalorder %v273_v39, %v274_v41 }
  0x48   : > { %v266_v44 = vsel %vm265_vm5, %v263_v38, %v264_v40  ;;  %v276_v45 = vsel %vm275_vm6, %v273_v39, %v274_v41 }
  0x49   : > { %v267_v46 = vrot.slane %v266_v44, 1  ;;  %v277_v47 = vrot.slane %v276_v45, 1 }
  0x4b   : > { %vm268_vm9 = vcmp.lt.s32.totalorder %v266_v44, %v267_v46  ;;  %vm278_vm10 = vcmp.lt.s32.totalorder %v276_v45, %v277_v47 }
  0x4c   : > { %v269_v48 = vsel %vm268_vm9, %v266_v44, %v267_v46  ;;  %v279_v49 = vsel %vm278_vm10, %v276_v45, %v277_v47 }
  0x4d   : > { %vm280_vm11 = vcmp.eq.s32.totalorder %v224_v17, %v269_v48  ;;  %vm281_vm12 = vcmp.eq.s32.totalorder %v224_v17, %v279_v49 }
  0x4e   : > { %v442_v52 = vsel %vm280_vm11, 1.0, %v591_v29  ;;  %v443_v53 = vsel %vm281_vm12, 1.0, %v591_v29 }
  0x4f   : > { %v308_v54 = vadd.f32 %v444_v50, %v442_v52  ;;  %v309_v55 = vadd.f32 %v445_v51, %v443_v53  ;;  %v297_v58 = vmul.f32 %v444_v50, %v442_v52  ;;  %v298_v59 = vmul.f32 %v445_v51, %v443_v53 }
  0x51   : > { %v310_v56 = vsel %vm231_vm0, %v308_v54, 0.0  ;;  %v311_v57 = vsel %vm231_vm0, %v309_v55, 0.0  ;;  %v299_v61 = vsel %vm231_vm0, %v297_v58, 0.0  ;;  %v300_v62 = vsel %vm231_vm0, %v298_v59, 0.0 }
  0x52   : > { %v312_v60 = vadd.f32 %v311_v57, %v310_v56  ;;  %v301_v63 = vadd.f32 %v300_v62, %v299_v61 }
  0x54   : > { %313 = vadd.xlane.f32.xlu0 %v312_v60 }
  0x5c   : > { %302 = vadd.xlane.f32.xlu0 %v301_v63 }
  0xc7   : > { %v314_v1 = vpop.xlane.xlu0 %313 }
  0xc8   : > { %v315_v2 = vadd.f32 %v314_v1, %v307_v0 }
  0xca   : > { %316 = vst.msk [vmem:[#allocation3] sm:$0xf] %vm216_vm2, %v315_v2 }
  0xcf   : > { %v303_v4 = vpop.xlane.xlu0 %302 }
  0xd0   : > { %v304_v5 = vadd.f32 %v303_v4, %v296_v3 }
  0xd1   : > { %v322_v6 = vld [vmem:[#allocation3] sm:$0xf] }
  0xd2   : > { %v323_v7 = vadd.f32 1e-05, %v322_v6  ;;  %306 = vst.msk [vmem:[#allocation2] sm:$0xf] %vm216_vm2, %v304_v5 }
  0xd4   : > { %506 = vrcp.f32 %v323_v7  ;;  %v335_v12 = vand.u32 2147483648, %v323_v7  ;;  %v333_v14 = vand.u32 2147483647, %v323_v7  ;;  %vm329_vm14 = vweird.f32 %v323_v7 }
  0xd6   : > { %v336_v17 = vor.u32 1.1754944e-38, %v335_v12  ;;  %vm334_vm0 = vcmp.eq.f32.partialorder %v333_v14, 8.507059e+37 }
  0xd9   : > { %v320_v11 = vld [vmem:[#allocation2] sm:$0xf] }
  0xda   : > { %v507_v8 = vpop.eup %506  ;;  %v321_v15 = vmul.f32 2.0, %v320_v11 }
  0xdb   : > { %v325_v9 = vmul.f32 %v507_v8, %v323_v7  ;;  %vm330_vm13 = vweird.f32 %v507_v8 }
  0xdc   : > { %vm331_vm15 = vmor %vm329_vm14, %vm330_vm13 }
  0xdd   : > { %v326_v10 = vsub.f32 1.0, %v325_v9 }
  0xdf   : > { %v327_v13 = vmul.f32 %v507_v8, %v326_v10 }
  0xe1   : > { %v328_v16 = vadd.f32 %v507_v8, %v327_v13 }
  0xe3   : > { %v332_v18 = vsel %vm331_vm15, %v507_v8, %v328_v16 }
  0xe4   : > { %v337_v19 = vsel %vm334_vm0, %v336_v17, %v332_v18 }
  0xe5   : > { %v338_v20 = vmul.f32 %v337_v19, %v321_v15 }
  0xe7   : > { %339 = vst.msk [vmem:[%s211_s22] sm:$0xf] %vm216_vm2, %v338_v20 }
  0xe8 PF: > { %s15_s14 = sadd.s32 1, %s588_s14   ;;  %s721_s9 = smov %s572_s10 }
  0xe9   : > { %p12_p0 = scmp.ge.s32.totalorder %s15_s14, 4   ;;  %s722_s10 = smov %s576_s11 }
  0xea   : > { %s723_s11 = smov %s656_s21  ;;  %s724_s12 = smov %s584_s13 }
  0xeb   : > { %s725_s13 = smov %s727_s16  ;;  %14 = sbr.rel (!%p12_p0) target bundleno = 4 (0x4), region = 79 }
  0xf0   :  { %359 = vsyncpa [#allocation5], 1 }
  0xf1   :  { %361 = vsyncpa [#allocation5 + $0x1], 1 }

</bundles_post_ra>
